<compile_context>
chip_gen: v5e
topology: v5e:2x2
jax: 0.10.0
libtpu: 0.0.40
codegen_flags: <defaults>
</compile_context>

<pallas_src>
import functools

import jax
import jax.numpy as jnp
from jax.experimental import pallas as pl
from jax.experimental.pallas import tpu as pltpu


# ----------------------------------------------------------------------------
# Pallas kernel: one grid step per batch element (weights resident across steps).
# ----------------------------------------------------------------------------
def _encoder_kernel(x_ref, wm_ref, wb_ref, o_ref, *, S, D, F, eps, many_to_one,
                    mxu_dtype):
    f32 = jnp.float32
    x = x_ref[...].reshape(S, D).astype(f32)          # leading unit-dim squeeze only
    xm = x.astype(mxu_dtype)

    # ---- Ref-level slab slices (static, sublane-aligned offsets) ----
    # matrix slab rows: [0:D]=wqkv^T (D,3D) | [D:2D]=wo^T | [2D:3D]=w1^T | [3D:3D+F]=w2^T
    wqkvT = wm_ref[0 * D:1 * D, 0:3 * D]               # (D, 3D), already mxu dtype
    woT = wm_ref[1 * D:2 * D, 0:D]                     # (D, D)
    w1T = wm_ref[2 * D:3 * D, 0:F]                     # (D, F)
    w2T = wm_ref[3 * D:3 * D + F, 0:D]                 # (F, D)

    bqkv = wb_ref[0:1, 0:3 * D].astype(f32)            # (1, 3D)  (bq pre-scaled)
    bo = wb_ref[1:2, 0:D].astype(f32)
    g1 = wb_ref[2:3, 0:D].astype(f32)
    be1 = wb_ref[3:4, 0:D].astype(f32)
    g2 = wb_ref[4:5, 0:D].astype(f32)
    be2 = wb_ref[5:6, 0:D].astype(f32)
    b1 = wb_ref[6:7, 0:F].astype(f32)
    b2 = wb_ref[7:8, 0:D].astype(f32)

    # ---- self-attention (single head: head_dim == D), fused QKV projection ----
    qkv = jnp.dot(xm, wqkvT, preferred_element_type=f32) + bqkv      # (S, 3D)
    q = qkv[:, 0 * D:1 * D]                                          # pre-scaled by 1/sqrt(D)
    k = qkv[:, 1 * D:2 * D]
    v = qkv[:, 2 * D:3 * D]

    # q @ k^T: contract over the feature dim (no explicit transpose feeding the MXU)
    scores = jax.lax.dot_general(
        q.astype(mxu_dtype), k.astype(mxu_dtype),
        (((1,), (1,)), ((), ())),
        preferred_element_type=f32)                                  # (S, S)

    # causal mask: query i attends to key j iff j <= i (src_mask 0 / -inf)
    row = jax.lax.broadcasted_iota(jnp.int32, (S, S), 0)
    col = jax.lax.broadcasted_iota(jnp.int32, (S, S), 1)
    scores = jnp.where(col <= row, scores, -jnp.inf)

    m = jnp.max(scores, axis=-1, keepdims=True)
    e = jnp.exp(scores - m)
    p = e * pl.reciprocal(jnp.sum(e, axis=-1, keepdims=True), approx=True)

    ctx = jnp.dot(p.astype(mxu_dtype), v.astype(mxu_dtype),
                  preferred_element_type=f32)                        # (S, D)
    attn = jnp.dot(ctx.astype(mxu_dtype), woT,
                   preferred_element_type=f32) + bo                  # (S, D)

    # ---- residual + post-LayerNorm (norm_first=False), all f32 elementwise ----
    def layer_norm(z, gamma, beta):
        mu = jnp.mean(z, axis=-1, keepdims=True)
        d = z - mu
        var = jnp.mean(d * d, axis=-1, keepdims=True)
        return d * jax.lax.rsqrt(var + eps) * gamma + beta

    x1 = layer_norm(x + attn, g1, be1)

    # ---- feed-forward: linear1 -> relu -> linear2 ----
    h = jnp.dot(x1.astype(mxu_dtype), w1T, preferred_element_type=f32) + b1   # (S, F)
    h = jnp.maximum(h, 0.0)
    ff = jnp.dot(h.astype(mxu_dtype), w2T, preferred_element_type=f32) + b2   # (S, D)

    x2 = layer_norm(x1 + ff, g2, be2)

    # ---- F.normalize(out, dim=-1, p=2): v / max(||v||_2, 1e-12) ----
    nrm = jnp.sqrt(jnp.sum(x2 * x2, axis=-1, keepdims=True))
    out = x2 / jnp.maximum(nrm, 1e-12)                               # (S, D)

    if many_to_one:
        o_ref[...] = jnp.sum(out, axis=0, keepdims=True).reshape(1, 1, D).astype(o_ref.dtype)
    else:
        o_ref[...] = out.reshape(1, S, D).astype(o_ref.dtype)


# ----------------------------------------------------------------------------
# Host-side parameter packing (parameter-only; can be precomputed once).
#   matrix slab (3D+F, max(3D,F)):  wqkv^T | wo^T | w1^T | w2^T   (mxu_dtype)
#   bias slab   (8,    max(3D,F)):  bqkv | bo | g1 | be1 | g2 | be2 | b1 | b2 (f32)
# 1/sqrt(D) attention scale is folded into wq / bq here.
# ----------------------------------------------------------------------------
def _pack_params(params, D, F, mxu_dtype):
    f32 = jnp.float32
    t = lambda a: jnp.asarray(a, f32)
    scale = 1.0 / (float(D) ** 0.5)

    wqkvT = jnp.concatenate(
        [t(params["wq"]).T * scale, t(params["wk"]).T, t(params["wv"]).T], axis=1)  # (D, 3D)
    woT = t(params["wo"]).T                                                         # (D, D)
    w1T = t(params["w1"]).T                                                         # (D, F)
    w2T = t(params["w2"]).T                                                         # (F, D)

    W = max(3 * D, F)

    def pad_cols(mat):
        return jnp.pad(mat, ((0, 0), (0, W - mat.shape[1])))

    wmat = jnp.concatenate(
        [pad_cols(wqkvT), pad_cols(woT), pad_cols(w1T), pad_cols(w2T)],
        axis=0).astype(mxu_dtype)                                                   # (3D+F, W)

    def rowv(v):
        v = t(v)
        return jnp.pad(v, (0, W - v.shape[0]))[None, :]

    bqkv = jnp.concatenate([t(params["bq"]) * scale, t(params["bk"]), t(params["bv"])])
    wbias = jnp.concatenate(
        [rowv(bqkv), rowv(params["bo"]),
         rowv(params["g1"]), rowv(params["be1"]),
         rowv(params["g2"]), rowv(params["be2"]),
         rowv(params["b1"]), rowv(params["b2"])],
        axis=0)                                                                     # (8, W)
    return wmat, wbias


# ----------------------------------------------------------------------------
# Wrapper.
# ----------------------------------------------------------------------------
def transformer_encoder_forward(x, params, *, layer_norm_eps=1e-5, many_to_one=False,
                                mxu_dtype=jnp.float32):
    """x: (B, S, D) float32. Returns (B, S, D), or (B, D) if many_to_one."""
    B, S, D = x.shape
    F_ = params["w1"].shape[0]  # dim_feedforward
    assert D % 8 == 0 and F_ % 8 == 0, "pad d_model / dim_feedforward to multiples of 8"

    wmat, wbias = _pack_params(params, D, F_, mxu_dtype)

    kernel = functools.partial(_encoder_kernel, S=S, D=D, F=F_, eps=layer_norm_eps,
                               many_to_one=many_to_one, mxu_dtype=mxu_dtype)

    x_spec = pl.BlockSpec((1, S, D), lambda b: (b, 0, 0))
    # Weight slabs: constant block index -> stay resident in VMEM across grid steps.
    wm_spec = pl.BlockSpec(wmat.shape, lambda b: (0, 0))
    wb_spec = pl.BlockSpec(wbias.shape, lambda b: (0, 0))

    if many_to_one:
        out_shape = jax.ShapeDtypeStruct((B, 1, D), jnp.float32)
        o_spec = pl.BlockSpec((1, 1, D), lambda b: (b, 0, 0))
    else:
        out_shape = jax.ShapeDtypeStruct((B, S, D), jnp.float32)
        o_spec = pl.BlockSpec((1, S, D), lambda b: (b, 0, 0))

    out = pl.pallas_call(
        kernel,
        out_shape=out_shape,
        grid=(B,),
        in_specs=[x_spec, wm_spec, wb_spec],
        out_specs=o_spec,
        compiler_params=pltpu.CompilerParams(
            dimension_semantics=("parallel",),          # batch steps -> both TCs on v7x
            vmem_limit_bytes=32 * 1024 * 1024),
    )(x.astype(jnp.float32), wmat, wbias)

    return out.reshape(B, D) if many_to_one else out


# ----------------------------------------------------------------------------
# Pure-JAX reference (mirrors PyTorch post-norm TransformerEncoderLayer math).
# ----------------------------------------------------------------------------
def reference_forward(x, params, *, eps=1e-5):
    D = x.shape[-1]

    def ln(z, g, b):
        mu = jnp.mean(z, axis=-1, keepdims=True)
        var = jnp.mean((z - mu) ** 2, axis=-1, keepdims=True)
        return (z - mu) / jnp.sqrt(var + eps) * g + b

    q = x @ params["wq"].T + params["bq"]
    k = x @ params["wk"].T + params["bk"]
    v = x @ params["wv"].T + params["bv"]
    scores = jnp.einsum("bqd,bkd->bqk", q, k) / jnp.sqrt(float(D))
    S = x.shape[1]
    causal = jnp.tril(jnp.ones((S, S), dtype=bool))
    scores = jnp.where(causal[None], scores, -jnp.inf)
    p = jax.nn.softmax(scores, axis=-1)
    ctx = jnp.einsum("bqk,bkd->bqd", p, v)
    attn = ctx @ params["wo"].T + params["bo"]
    x1 = ln(x + attn, params["g1"], params["be1"])
    h = jax.nn.relu(x1 @ params["w1"].T + params["b1"])
    ff = h @ params["w2"].T + params["b2"]
    x2 = ln(x1 + ff, params["g2"], params["be2"])
    nrm = jnp.sqrt(jnp.sum(x2 * x2, axis=-1, keepdims=True))
    return x2 / jnp.maximum(nrm, 1e-12)


# ----------------------------------------------------------------------------
# Main
# ----------------------------------------------------------------------------
if __name__ == "__main__":
    B, S, D, FF = 2, 8, 16, 32   # batch, seq, d_model, dim_feedforward (nhead=1)

    key = jax.random.PRNGKey(0)
    keys = jax.random.split(key, 13)

    def w(k, shape, scale=0.1):
        return (scale * jax.random.normal(k, shape)).astype(jnp.float32)

    params = {
        "wq": w(keys[0], (D, D)), "bq": w(keys[1], (D,)),
        "wk": w(keys[2], (D, D)), "bk": w(keys[3], (D,)),
        "wv": w(keys[4], (D, D)), "bv": w(keys[5], (D,)),
        "wo": w(keys[6], (D, D)), "bo": w(keys[7], (D,)),
        "w1": w(keys[8], (FF, D)), "b1": w(keys[9], (FF,)),
        "w2": w(keys[10], (D, FF)), "b2": w(keys[11], (D,)),
        "g1": jnp.ones((D,), jnp.float32), "be1": jnp.zeros((D,), jnp.float32),
        "g2": jnp.ones((D,), jnp.float32), "be2": jnp.zeros((D,), jnp.float32),
    }

    x = jax.random.normal(keys[12], (B, S, D), dtype=jnp.float32)

    ref = reference_forward(x, params, eps=1e-5)

    # f32 MXU path (default): tight parity with the reference.
    out = transformer_encoder_forward(x, params, layer_norm_eps=1e-5,
                                      many_to_one=False)
    out = jax.block_until_ready(out)
    assert out.shape == (B, S, D)
    assert bool(jnp.all(jnp.isfinite(out)))
    assert bool(jnp.allclose(out, ref, rtol=1e-3, atol=1e-3)), "mismatch vs reference"

    # fused many_to_one path (sum over TIME_DIM done in-kernel)
    out_m21 = transformer_encoder_forward(x, params, layer_norm_eps=1e-5,
                                          many_to_one=True)
    out_m21 = jax.block_until_ready(out_m21)
    assert out_m21.shape == (B, D)
    assert bool(jnp.allclose(out_m21, jnp.sum(ref, axis=1),
                             rtol=1e-3, atol=1e-3)), "many_to_one mismatch"

    # bf16 MXU operands (v6e/v7x recommendation): f32 accumulate, f32 elementwise.
    out_bf16 = transformer_encoder_forward(x, params, layer_norm_eps=1e-5,
                                           many_to_one=False, mxu_dtype=jnp.bfloat16)
    out_bf16 = jax.block_until_ready(out_bf16)
    assert out_bf16.shape == (B, S, D)
    assert bool(jnp.all(jnp.isfinite(out_bf16)))
    assert bool(jnp.allclose(out_bf16, ref, rtol=5e-2, atol=5e-2)), "bf16 path mismatch"

    print("KERNEL_OK")
</pallas_src>

<mosaic_0001>
module attributes {stable_mosaic.version = 11 : i64} {
  func.func @_encoder_kernel(%arg0: i32, %arg1: memref<1x8x16xf32, #tpu.memory_space<vmem>>, %arg2: memref<80x48xf32, #tpu.memory_space<vmem>>, %arg3: memref<8x48xf32, #tpu.memory_space<vmem>>, %arg4: memref<1x8x16xf32, #tpu.memory_space<vmem>>) attributes {dimension_semantics = [#tpu.dimension_semantics<parallel>], iteration_bounds = array<i64: 2>, scalar_prefetch = 0 : i64, scratch_operands = 0 : i64, tpu.core_type = #tpu.core_type<tc>, window_params = [{transform_indices = @transform_0, window_bounds = array<i64: 1, 8, 16>}, {pipeline_mode = #tpu.pipeline_mode<synchronous>, transform_indices = @transform_1, window_bounds = array<i64: 80, 48>}, {pipeline_mode = #tpu.pipeline_mode<synchronous>, transform_indices = @transform_2, window_bounds = array<i64: 8, 48>}, {transform_indices = @transform_3, window_bounds = array<i64: 1, 8, 16>}]} {
    %c0 = arith.constant 0 : index
    %c0_0 = arith.constant 0 : index
    %c0_1 = arith.constant 0 : index
    %0 = vector.load %arg1[%c0, %c0_0, %c0_1] : memref<1x8x16xf32, #tpu.memory_space<vmem>>, vector<1x8x16xf32>
    %1 = vector.shape_cast %0 : vector<1x8x16xf32> to vector<8x16xf32>
    %c0_2 = arith.constant 0 : index
    %c0_3 = arith.constant 0 : index
    %2 = vector.load %arg2[%c0_2, %c0_3] : memref<80x48xf32, #tpu.memory_space<vmem>>, vector<16x48xf32>
    %c16 = arith.constant 16 : index
    %c0_4 = arith.constant 0 : index
    %3 = vector.load %arg2[%c16, %c0_4] : memref<80x48xf32, #tpu.memory_space<vmem>>, vector<16x16xf32>
    %c32 = arith.constant 32 : index
    %c0_5 = arith.constant 0 : index
    %4 = vector.load %arg2[%c32, %c0_5] : memref<80x48xf32, #tpu.memory_space<vmem>>, vector<16x32xf32>
    %c48 = arith.constant 48 : index
    %c0_6 = arith.constant 0 : index
    %5 = vector.load %arg2[%c48, %c0_6] : memref<80x48xf32, #tpu.memory_space<vmem>>, vector<32x16xf32>
    %c0_7 = arith.constant 0 : index
    %c0_8 = arith.constant 0 : index
    %6 = vector.load %arg3[%c0_7, %c0_8] : memref<8x48xf32, #tpu.memory_space<vmem>>, vector<1x48xf32>
    %c1 = arith.constant 1 : index
    %c0_9 = arith.constant 0 : index
    %7 = vector.load %arg3[%c1, %c0_9] : memref<8x48xf32, #tpu.memory_space<vmem>>, vector<1x16xf32>
    %c2 = arith.constant 2 : index
    %c0_10 = arith.constant 0 : index
    %8 = vector.load %arg3[%c2, %c0_10] : memref<8x48xf32, #tpu.memory_space<vmem>>, vector<1x16xf32>
    %c3 = arith.constant 3 : index
    %c0_11 = arith.constant 0 : index
    %9 = vector.load %arg3[%c3, %c0_11] : memref<8x48xf32, #tpu.memory_space<vmem>>, vector<1x16xf32>
    %c4 = arith.constant 4 : index
    %c0_12 = arith.constant 0 : index
    %10 = vector.load %arg3[%c4, %c0_12] : memref<8x48xf32, #tpu.memory_space<vmem>>, vector<1x16xf32>
    %c5 = arith.constant 5 : index
    %c0_13 = arith.constant 0 : index
    %11 = vector.load %arg3[%c5, %c0_13] : memref<8x48xf32, #tpu.memory_space<vmem>>, vector<1x16xf32>
    %c6 = arith.constant 6 : index
    %c0_14 = arith.constant 0 : index
    %12 = vector.load %arg3[%c6, %c0_14] : memref<8x48xf32, #tpu.memory_space<vmem>>, vector<1x32xf32>
    %c7 = arith.constant 7 : index
    %c0_15 = arith.constant 0 : index
    %13 = vector.load %arg3[%c7, %c0_15] : memref<8x48xf32, #tpu.memory_space<vmem>>, vector<1x16xf32>
    %cst = arith.constant dense<0.000000e+00> : vector<8x48xf32>
    %14 = tpu.matmul %1, %2, %cst {dimension_numbers = #tpu.dot_dimension_numbers<[1], [0], [0], [1], [0, 0, 1, 1], [], []>} : vector<8x16xf32>, vector<16x48xf32>, vector<8x48xf32> -> vector<8x48xf32>
    %15 = vector.broadcast %6 : vector<1x48xf32> to vector<8x48xf32>
    %16 = arith.addf %14, %15 : vector<8x48xf32>
    %17 = vector.extract_strided_slice %16 {offsets = [0, 0], sizes = [8, 16], strides = [1, 1]} : vector<8x48xf32> to vector<8x16xf32>
    %18 = vector.extract_strided_slice %16 {offsets = [0, 16], sizes = [8, 16], strides = [1, 1]} : vector<8x48xf32> to vector<8x16xf32>
    %19 = vector.extract_strided_slice %16 {offsets = [0, 32], sizes = [8, 16], strides = [1, 1]} : vector<8x48xf32> to vector<8x16xf32>
    %cst_16 = arith.constant dense<0.000000e+00> : vector<8x8xf32>
    %20 = tpu.matmul %17, %18, %cst_16 {dimension_numbers = #tpu.dot_dimension_numbers<[1], [1], [0], [0], [0, 0, 1, 0], [], []>} : vector<8x16xf32>, vector<8x16xf32>, vector<8x8xf32> -> vector<8x8xf32>
    %21 = tpu.iota {dimensions = array<i32: 0>} : vector<8x8xi32>
    %22 = tpu.iota {dimensions = array<i32: 1>} : vector<8x8xi32>
    %23 = arith.cmpi sle, %22, %21 : vector<8x8xi32>
    %cst_17 = arith.constant 0xFF800000 : f32
    %24 = vector.broadcast %cst_17 : f32 to vector<8x8xf32>
    %25 = arith.select %23, %20, %24 : vector<8x8xi1>, vector<8x8xf32>
    %cst_18 = arith.constant dense<0xFF800000> : vector<8xf32>
    %26 = vector.multi_reduction <maximumf>, %25, %cst_18 [1] : vector<8x8xf32> to vector<8xf32>
    %27 = vector.shape_cast %26 : vector<8xf32> to vector<8x1xf32>
    %28 = vector.broadcast %27 : vector<8x1xf32> to vector<8x8xf32>
    %29 = arith.subf %25, %28 : vector<8x8xf32>
    %30 = math.exp %29 : vector<8x8xf32>
    %cst_19 = arith.constant dense<0.000000e+00> : vector<8xf32>
    %31 = vector.multi_reduction <add>, %30, %cst_19 [1] : vector<8x8xf32> to vector<8xf32>
    %32 = vector.shape_cast %31 : vector<8xf32> to vector<8x1xf32>
    %33 = tpu.reciprocal %32 {approx = true} : vector<8x1xf32> -> vector<8x1xf32>
    %34 = vector.broadcast %33 : vector<8x1xf32> to vector<8x8xf32>
    %35 = arith.mulf %30, %34 : vector<8x8xf32>
    %cst_20 = arith.constant dense<0.000000e+00> : vector<8x16xf32>
    %36 = tpu.matmul %35, %19, %cst_20 {dimension_numbers = #tpu.dot_dimension_numbers<[1], [0], [0], [1], [0, 0, 1, 1], [], []>} : vector<8x8xf32>, vector<8x16xf32>, vector<8x16xf32> -> vector<8x16xf32>
    %cst_21 = arith.constant dense<0.000000e+00> : vector<8x16xf32>
    %37 = tpu.matmul %36, %3, %cst_21 {dimension_numbers = #tpu.dot_dimension_numbers<[1], [0], [0], [1], [0, 0, 1, 1], [], []>} : vector<8x16xf32>, vector<16x16xf32>, vector<8x16xf32> -> vector<8x16xf32>
    %38 = vector.broadcast %7 : vector<1x16xf32> to vector<8x16xf32>
    %39 = arith.addf %37, %38 : vector<8x16xf32>
    %40 = arith.addf %1, %39 : vector<8x16xf32>
    %cst_22 = arith.constant dense<0.000000e+00> : vector<8xf32>
    %41 = vector.multi_reduction <add>, %40, %cst_22 [1] : vector<8x16xf32> to vector<8xf32>
    %42 = vector.shape_cast %41 : vector<8xf32> to vector<8x1xf32>
    %cst_23 = arith.constant 1.600000e+01 : f32
    %43 = vector.broadcast %cst_23 : f32 to vector<8x1xf32>
    %44 = arith.divf %42, %43 : vector<8x1xf32>
    %45 = vector.broadcast %44 : vector<8x1xf32> to vector<8x16xf32>
    %46 = arith.subf %40, %45 : vector<8x16xf32>
    %47 = arith.mulf %46, %46 : vector<8x16xf32>
    %cst_24 = arith.constant dense<0.000000e+00> : vector<8xf32>
    %48 = vector.multi_reduction <add>, %47, %cst_24 [1] : vector<8x16xf32> to vector<8xf32>
    %49 = vector.shape_cast %48 : vector<8xf32> to vector<8x1xf32>
    %cst_25 = arith.constant 1.600000e+01 : f32
    %50 = vector.broadcast %cst_25 : f32 to vector<8x1xf32>
    %51 = arith.divf %49, %50 : vector<8x1xf32>
    %cst_26 = arith.constant 9.99999974E-6 : f32
    %52 = vector.broadcast %cst_26 : f32 to vector<8x1xf32>
    %53 = arith.addf %51, %52 : vector<8x1xf32>
    %54 = math.rsqrt %53 : vector<8x1xf32>
    %55 = vector.broadcast %54 : vector<8x1xf32> to vector<8x16xf32>
    %56 = arith.mulf %46, %55 : vector<8x16xf32>
    %57 = vector.broadcast %8 : vector<1x16xf32> to vector<8x16xf32>
    %58 = arith.mulf %56, %57 : vector<8x16xf32>
    %59 = vector.broadcast %9 : vector<1x16xf32> to vector<8x16xf32>
    %60 = arith.addf %58, %59 : vector<8x16xf32>
    %cst_27 = arith.constant dense<0.000000e+00> : vector<8x32xf32>
    %61 = tpu.matmul %60, %4, %cst_27 {dimension_numbers = #tpu.dot_dimension_numbers<[1], [0], [0], [1], [0, 0, 1, 1], [], []>} : vector<8x16xf32>, vector<16x32xf32>, vector<8x32xf32> -> vector<8x32xf32>
    %62 = vector.broadcast %12 : vector<1x32xf32> to vector<8x32xf32>
    %63 = arith.addf %61, %62 : vector<8x32xf32>
    %cst_28 = arith.constant 0.000000e+00 : f32
    %64 = vector.broadcast %cst_28 : f32 to vector<8x32xf32>
    %65 = arith.maximumf %63, %64 : vector<8x32xf32>
    %cst_29 = arith.constant dense<0.000000e+00> : vector<8x16xf32>
    %66 = tpu.matmul %65, %5, %cst_29 {dimension_numbers = #tpu.dot_dimension_numbers<[1], [0], [0], [1], [0, 0, 1, 1], [], []>} : vector<8x32xf32>, vector<32x16xf32>, vector<8x16xf32> -> vector<8x16xf32>
    %67 = vector.broadcast %13 : vector<1x16xf32> to vector<8x16xf32>
    %68 = arith.addf %66, %67 : vector<8x16xf32>
    %69 = arith.addf %60, %68 : vector<8x16xf32>
    %cst_30 = arith.constant dense<0.000000e+00> : vector<8xf32>
    %70 = vector.multi_reduction <add>, %69, %cst_30 [1] : vector<8x16xf32> to vector<8xf32>
    %71 = vector.shape_cast %70 : vector<8xf32> to vector<8x1xf32>
    %cst_31 = arith.constant 1.600000e+01 : f32
    %72 = vector.broadcast %cst_31 : f32 to vector<8x1xf32>
    %73 = arith.divf %71, %72 : vector<8x1xf32>
    %74 = vector.broadcast %73 : vector<8x1xf32> to vector<8x16xf32>
    %75 = arith.subf %69, %74 : vector<8x16xf32>
    %76 = arith.mulf %75, %75 : vector<8x16xf32>
    %cst_32 = arith.constant dense<0.000000e+00> : vector<8xf32>
    %77 = vector.multi_reduction <add>, %76, %cst_32 [1] : vector<8x16xf32> to vector<8xf32>
    %78 = vector.shape_cast %77 : vector<8xf32> to vector<8x1xf32>
    %cst_33 = arith.constant 1.600000e+01 : f32
    %79 = vector.broadcast %cst_33 : f32 to vector<8x1xf32>
    %80 = arith.divf %78, %79 : vector<8x1xf32>
    %cst_34 = arith.constant 9.99999974E-6 : f32
    %81 = vector.broadcast %cst_34 : f32 to vector<8x1xf32>
    %82 = arith.addf %80, %81 : vector<8x1xf32>
    %83 = math.rsqrt %82 : vector<8x1xf32>
    %84 = vector.broadcast %83 : vector<8x1xf32> to vector<8x16xf32>
    %85 = arith.mulf %75, %84 : vector<8x16xf32>
    %86 = vector.broadcast %10 : vector<1x16xf32> to vector<8x16xf32>
    %87 = arith.mulf %85, %86 : vector<8x16xf32>
    %88 = vector.broadcast %11 : vector<1x16xf32> to vector<8x16xf32>
    %89 = arith.addf %87, %88 : vector<8x16xf32>
    %90 = arith.mulf %89, %89 : vector<8x16xf32>
    %cst_35 = arith.constant dense<0.000000e+00> : vector<8xf32>
    %91 = vector.multi_reduction <add>, %90, %cst_35 [1] : vector<8x16xf32> to vector<8xf32>
    %92 = vector.shape_cast %91 : vector<8xf32> to vector<8x1xf32>
    %93 = math.sqrt %92 : vector<8x1xf32>
    %cst_36 = arith.constant 9.99999996E-13 : f32
    %94 = vector.broadcast %cst_36 : f32 to vector<8x1xf32>
    %95 = arith.maximumf %93, %94 : vector<8x1xf32>
    %96 = vector.broadcast %95 : vector<8x1xf32> to vector<8x16xf32>
    %97 = arith.divf %89, %96 : vector<8x16xf32>
    %98 = vector.shape_cast %97 : vector<8x16xf32> to vector<1x8x16xf32>
    %c0_37 = arith.constant 0 : index
    %c0_38 = arith.constant 0 : index
    %c0_39 = arith.constant 0 : index
    %99 = vector.load %arg4[%c0_37, %c0_38, %c0_39] : memref<1x8x16xf32, #tpu.memory_space<vmem>>, vector<1x8x16xf32>
    tpu.vector_store %arg4[%c0_37, %c0_38, %c0_39], %98 {strides = array<i32>} : memref<1x8x16xf32, #tpu.memory_space<vmem>>, vector<1x8x16xf32>,
    return
  }
  func.func @transform_0(%arg0: i32) -> (i32, i32, i32) {
    %c0_i32 = arith.constant 0 : i32
    %c0_i32_0 = arith.constant 0 : i32
    %c0_i32_1 = arith.constant 0 : i32
    return %arg0, %c0_i32, %c0_i32_0 : i32, i32, i32
  }
  func.func @transform_1(%arg0: i32) -> (i32, i32) {
    %c0_i32 = arith.constant 0 : i32
    %c0_i32_0 = arith.constant 0 : i32
    %c0_i32_1 = arith.constant 0 : i32
    return %c0_i32, %c0_i32_0 : i32, i32
  }
  func.func @transform_2(%arg0: i32) -> (i32, i32) {
    %c0_i32 = arith.constant 0 : i32
    %c0_i32_0 = arith.constant 0 : i32
    %c0_i32_1 = arith.constant 0 : i32
    return %c0_i32, %c0_i32_0 : i32, i32
  }
  func.func @transform_3(%arg0: i32) -> (i32, i32, i32) {
    %c0_i32 = arith.constant 0 : i32
    %c0_i32_0 = arith.constant 0 : i32
    %c0_i32_1 = arith.constant 0 : i32
    return %arg0, %c0_i32, %c0_i32_0 : i32, i32, i32
  }
}

</mosaic_0001>

<bundles_post_ra>
// kernel: tpu_custom_call.1
= control target key start
LH: loop header
LB: loop body
LE: loop exit
PB: predicated region body
PF: predicated region fallthrough
CT: control target
= control target key end

     0   :  { %8 = vsyncpa [#allocation3], 0  ;;  %s845_s0 = inlined_call_operand.vmem [shape: f32[2,8,16], index: 0, kind: input, shape index: {}]   ;;  %s846_s1 = inlined_call_operand.vmem [shape: f32[80,48], index: 1, kind: input, shape index: {}]   ;;  %s847_s2 = inlined_call_operand.vmem [shape: f32[8,48], index: 2, kind: input, shape index: {}]   ;;  %s848_s3 = inlined_call_operand.hbm [shape: f32[2,8,16], index: 3, kind: output, shape index: {}]  }
   0x1   :  { %10 = vsyncpa [#allocation3 + $0x1], 0  ;;  %s692_s12 = smov 0   ;;  %s694_s13 = smov 0  }
   0x2   :  { %s696_s14 = smov 0   ;;  %s698_s15 = smov 0  }
   0x3 LB: > { %s713_s16 = sadd.s32 4294967295, %s667_s15   ;;  %s524_s17 = sadd.s32 4294967294, %s667_s15   ;;  %s667_s15 = sphi %s698_s15, %s854_s15   ;;  %s663_s14 = sphi %s696_s14, %s853_s14   ;;  %s659_s13 = sphi %s694_s13, %s852_s13   ;;  %s655_s12 = sphi %s692_s12, %s851_s12  }
   0x4   : > { %s717_s18 = sadd.s32 1, %s667_s15   ;;  %s91_s19 = sadd.s32 1, %s663_s14 }
   0x5   : > { %s88_s20 = ssub.s32 %s667_s15, %s717_s18  ;;  %p101_p0 = scmp.ne.s32.totalorder %s663_s14, %s659_s13 }
   0x6   : > { %p89_p1 = scmp.eq.s32.totalorder %s88_s20, 0  ;;  %p102_p2 = scmp.eq.s32.totalorder %s713_s16, 1 }
   0x7   : > { %p107_p3 = scmp.ne.s32.totalorder %s659_s13, %s655_s12  ;;  %p108_p4 = scmp.eq.s32.totalorder %s524_s17, 1 }
   0x8   : > { %s728_s21 = scalar_select %p89_p1, %s663_s14, %s91_s19  }
   0x9   : > { %p730_p5 = por %p102_p2, %p101_p0  ;;  %p734_p6 = por %p108_p4, %p107_p3 }
   0xa   : > { %p527_p7 = scmp.ge.s32.totalorder %s667_s15, 1  ;;  %p139_p8 = scmp.lt.s32.totalorder %s667_s15, 3 }
   0xc   : > { %p140_p9 = pnand %p527_p7, %p139_p8 }
   0xd   : > { %p162_p10 = scmp.lt.s32.totalorder (!%p140_p9), %s713_s16, 1  ;;  %s669_s8 = smov (!%p140_p9), 112  }
   0xe   : > { %143 = sbr.rel (%p140_p9) target bundleno = 1901 (0x76d), region = 32  ;;  %s670_s9 = smov (!%p140_p9), 96  }
   0xf   : > { %s159_s4 = sand.u32 (!%p140_p9), 1, %s659_s13   ;;  %s538_s6 = sshll.u32 (!%p140_p9), %s713_s16, 3 }
  0x10   : > { %s625_s26 = scalar_lea.hbm (!%p140_p9), %s848_s3, 16 }
  0x13   : > { %v168_v0 = vld [vmem:[%s846_s1 + $0x8] sm:$0xff]  ;;  %v167_v1 = vld [vmem:[%s846_s1] sm:$0xff]  ;;  %s163_s28 = scalar_select %p162_p10, %s713_s16, 1  ;;  %vm186_vm0 = vcmask 130048   ;;  %v237_v7 = vlaneseq  ;;  %vm243_vm2 = vcmask 64512   ;;  %v170_v18 = vld [vmem:[%s846_s1 + $0x18] sm:$0xff] }
  0x14   : > { %204 = vmatpush.msra.mxu0 %v168_v0  ;;  %v583_v3 = vld [vmem:[%s847_s2] ss:$0 sm:$0xff]  ;;  %299 = vmatpush.msra.mxu3 %v170_v18  ;;  %v169_v23 = vld [vmem:[%s846_s1 + $0x10] sm:$0xff]  ;;  %v584_v25 = vld [vmem:[%s847_s2 + $0x1] ss:$0 sm:$0xff]  ;;  %v671_v30 = vmov 16.0  }
  0x15   : > { %s529_s29 = sshll.u32 %s163_s28, 3  ;;  %v238_v8 = vshrl.u32 %v237_v7, 7  ;;  %v240_v9 = vand.u32 127, %v237_v7  ;;  %v172_v42 = vld [vmem:[%s846_s1 + $0x28] sm:$0xff]  ;;  %v171_v43 = vld [vmem:[%s846_s1 + $0x20] sm:$0xff]  ;;  %v174_v61 = vld [vmem:[%s846_s1 + $0x38] sm:$0xff] }
  0x16   : > { %205 = vmatpush.msra.mxu0 %v167_v1  ;;  %s165_s5 = scalar_lea.vmem %s845_s0, %s529_s29  ;;  %300 = vmatpush.msra.mxu3 %v169_v23  ;;  %v176_v44 = vld [vmem:[%s846_s1 + $0x48] sm:$0xff]  ;;  %v175_v45 = vld [vmem:[%s846_s1 + $0x40] sm:$0xff]  ;;  %v173_v62 = vld [vmem:[%s846_s1 + $0x30] sm:$0xff]  ;;  %vm365_vm7 = vcmask 261120   ;;  %s450_s16 = scalar_lea.sflag [#allocation3], %s159_s4 }
  0x17   : > { %v166_v2 = vld [vmem:[%s165_s5] sm:$0xff]  ;;  %vm241_vm1 = vcmp.le.s32.totalorder %v240_v9, %v238_v8  ;;  %s528_s5 = sshll.u32 %s159_s4, 3 }
  0x18   : > { %530 = vmatmul.msk.f32.vlgmr.msra.gmra.mxu0 %vm186_vm0, %v166_v2  ;;  %v585_v55 = vld [vmem:[%s847_s2 + $0x2] ss:$0 sm:$0xff]  ;;  %v586_v58 = vld [vmem:[%s847_s2 + $0x3] ss:$0 sm:$0xff]  ;;  %v587_v63 = vld [vmem:[%s847_s2 + $0x6] ss:$0 sm:$0xff] }
  0x19   : > { %381 = vmatpush.msrb.mxu0 %v176_v44  ;;  %s161_s10 = scalar_lea.vmem [#allocation2], %s528_s5 }
  0x1a   : > { %s462_s11 = sshll.u32 %s161_s10, 4  ;;  %s463_s11 = int_to_ptr.vmem [resolvable:$true] %s462_s11 }
  0x1b   : > { %382 = vmatpush.msrb.mxu0 %v175_v45 }
  0x1d   : > { %383 = vmatpush.msrb.mxu0 %v174_v61 }
  0x1f   : > { %384 = vmatpush.msrb.mxu0 %v173_v62 }
  0x95   : > { %v207_v4 = vpop.f32.mrf.mxu0 }
  0x96   : > { %v208_v5 = vadd.f32 %v583_v3, %v207_v4  ;;  %v588_v3 = vld [vmem:[%s847_s2 + $0x7] ss:$0 sm:$0xff] }
  0x98   : > { %211 = vrot.lane.b32.xlu0 %v208_v5, %s669_s8 }
 0x10a   : > { %v212_v6 = vpop.permute.xlu0 %211 }
 0x10b   : > { %531 = vmatpush.xpose.msk.msra.mxu1 %vm186_vm0, %v212_v6 }
 0x10e   : > { %532 = vmatmul.msk.f32.vlgmr.msra.gmra.mxu1 %vm186_vm0, %v208_v5 }
 0x18b   : > { %v234_v10 = vpop.f32.mrf.mxu1 }
 0x18c   : > { %v242_v11 = vsel %vm241_vm1, %v234_v10, -inf }
 0x18d   : > { %v244_v12 = vsel %vm243_vm2, %v242_v11, -inf }
 0x18e   : > { %245 = vmax.xlane.f32.xlu0 %v244_v12 }
 0x201   : > { %v246_v13 = vpop.xlane.xlu0 %245 }
 0x202   : > { %v247_v14 = vsub.f32 %v242_v11, %v246_v13 }
 0x204   : > { %v248_v15 = vmul.f32 1.442695, %v247_v14 }
 0x206   : > { %591 = vpow2.f32 %v248_v15 }
 0x20c   : > { %v592_v16 = vpop.eup %591 }
 0x20d   : > { %v250_v17 = vsel %vm243_vm2, %v592_v16, 0.0 }
 0x20e   : > { %251 = vadd.xlane.f32.xlu1 %v250_v17 }
 0x227   : > { %255 = vrot.lane.b32.xlu1 %v208_v5, %s670_s9  ;;  %s460_s9 = scalar_lea.hbm %s848_s3, %s538_s6 }
 0x228   : > { %s464_s17 = sshll.u32 %s460_s9, 4  ;;  %s465_s17 = int_to_ptr.hbm [resolvable:$true] %s464_s17 }
 0x229   : > { %s619_s19 = sshra.s32 %s465_s17, 4  ;;  %s620_s19 = int_to_ptr.hbm [resolvable:$true] %s619_s19 }
 0x22a   : > { %s621_s20 = scalar_lea.hbm %s620_s19, 8  ;;  %p626_p0 = scmp.lt.s32.totalorder %s620_s19, %s848_s3 }
 0x22b   : > { %p622_p11 = scmp.ne.s32.totalorder %s620_s19, %s621_s20  ;;  %p627_p1 = scmp.lt.s32.totalorder %s625_s26, %s621_s20 }
 0x22d   : > { %p623_p12 = pnand %p622_p11, %p730_p5  ;;  %p628_p2 = por %p627_p1, %p626_p0 }
 0x22f   : > { %p624_p13 = pneg %p623_p12 }
 0x231   : > { %p629_p3 = pnand %p628_p2, %p624_p13 }
 0x281   : > { %v252_v19 = vpop.xlane.xlu1 %251 }
 0x282   : > { %593 = vrcp.f32 %v252_v19 }
 0x283   : > { %595 = vrcp.f32 %v671_v30 }
 0x288   : > { %v594_v20 = vpop.eup %593 }
 0x289   : > { %v254_v22 = vmul.f32 %v594_v20, %v592_v16  ;;  %v596_v31 = vpop.eup %595 }
 0x28a   : > { %v310_v32 = vmul.f32 16.0, %v596_v31  ;;  %vm314_vm3 = vweird.f32 %v596_v31 }
 0x28c   : > { %v311_v33 = vsub.f32 1.0, %v310_v32 }
 0x28e   : > { %v312_v34 = vmul.f32 %v596_v31, %v311_v33 }
 0x290   : > { %v313_v35 = vadd.f32 %v596_v31, %v312_v34 }
 0x292   : > { %v315_v36 = vsel %vm314_vm3, %v596_v31, %v313_v35 }
 0x299   : > { %v256_v21 = vpop.permute.xlu1 %255 }
 0x29a   : > { %276 = vmatpush.msra.mxu2 %v256_v21 }
 0x29b   : > { %533 = vmatmul.msk.f32.vlgmr.msra.gmra.mxu2 %vm243_vm2, %v254_v22  ;;  %v589_v22 = vld [vmem:[%s847_s2 + $0x4] ss:$0 sm:$0xff] }
 0x29c   : > { %357 = vmatpush.msrb.mxu2 %v172_v42 }
 0x29e   : > { %358 = vmatpush.msrb.mxu2 %v171_v43 }
 0x31e   : > { %v278_v24 = vpop.f32.mrf.mxu2 }
 0x31f   : > { %534 = vmatmul.msk.f32.vlgmr.msra.gmra.mxu3 %vm186_vm0, %v278_v24 }
 0x3a2   : > { %v302_v26 = vpop.f32.mrf.mxu3 }
 0x3a3   : > { %v303_v27 = vadd.f32 %v584_v25, %v302_v26  ;;  %v590_v25 = vld [vmem:[%s847_s2 + $0x5] ss:$0 sm:$0xff] }
 0x3a5   : > { %v305_v28 = vadd.f32 %v303_v27, %v166_v2 }
 0x3a7   : > { %v306_v29 = vsel %vm186_vm0, %v305_v28, 0.0 }
 0x3a8   : > { %307 = vadd.xlane.f32.xlu2 %v306_v29 }
 0x41b   : > { %v308_v37 = vpop.xlane.xlu2 %307 }
 0x41c   : > { %v316_v38 = vmul.f32 %v315_v36, %v308_v37 }
 0x41e   : > { %v317_v39 = vsub.f32 %v305_v28, %v316_v38 }
 0x420   : > { %v318_v40 = vmul.f32 %v317_v39, %v317_v39 }
 0x422   : > { %v319_v41 = vsel %vm186_vm0, %v318_v40, 0.0 }
 0x423   : > { %320 = vadd.xlane.f32.xlu2 %v319_v41 }
 0x496   : > { %v321_v46 = vpop.xlane.xlu2 %320 }
 0x497   : > { %v322_v47 = vmul.f32 %v321_v46, %v315_v36 }
 0x499   : > { %v323_v48 = vadd.f32 1e-05, %v322_v47 }
 0x49b   : > { %597 = vrsqrt.f32 %v323_v48  ;;  %vm330_vm5 = vweird.f32 %v323_v48 }
 0x4a1   : > { %v598_v49 = vpop.eup %597 }
 0x4a2   : > { %v325_v50 = vmul.f32 %v598_v49, %v323_v48  ;;  %vm331_vm4 = vweird.f32 %v598_v49 }
 0x4a3   : > { %vm332_vm6 = vmor %vm330_vm5, %vm331_vm4 }
 0x4a4   : > { %v326_v51 = vmul.f32 %v598_v49, %v325_v50 }
 0x4a6   : > { %v327_v52 = vmul.f32 0.5, %v326_v51 }
 0x4a8   : > { %v328_v53 = vsub.f32 1.5, %v327_v52 }
 0x4aa   : > { %v329_v54 = vmul.f32 %v598_v49, %v328_v53 }
 0x4ac   : > { %v333_v56 = vsel %vm332_vm6, %v598_v49, %v329_v54 }
 0x4ad   : > { %v334_v57 = vmul.f32 %v333_v56, %v317_v39 }
 0x4af   : > { %v336_v59 = vmul.f32 %v585_v55, %v334_v57 }
 0x4b1   : > { %v338_v60 = vadd.f32 %v586_v58, %v336_v59 }
 0x4b3   : > { %535 = vmatmul.msk.f32.vlgmr.msrb.gmra.mxu2 %vm186_vm0, %v338_v60 }
 0x536   : > { %v360_v0 = vpop.f32.mrf.mxu2 }
 0x537   : > { %v361_v1 = vadd.f32 %v587_v63, %v360_v0 }
 0x539   : > { %v363_v2 = vmax.f32 %v361_v1, 0.0 }
 0x53b   : > { %536 = vmatmul.msk.f32.vlgmr.msrb.gmra.mxu0 %vm365_vm7, %v363_v2 }
 0x5b8   : > { %v386_v4 = vpop.f32.mrf.mxu0 }
 0x5b9   : > { %v387_v5 = vadd.f32 %v588_v3, %v386_v4 }
 0x5bb   : > { %v389_v6 = vadd.f32 %v387_v5, %v338_v60 }
 0x5bd   : > { %v390_v7 = vsel %vm186_vm0, %v389_v6, 0.0 }
 0x5be   : > { %391 = vadd.xlane.f32.xlu2 %v390_v7 }
 0x631   : > { %v392_v8 = vpop.xlane.xlu2 %391 }
 0x632   : > { %v393_v9 = vmul.f32 %v392_v8, %v315_v36 }
 0x634   : > { %v394_v10 = vsub.f32 %v389_v6, %v393_v9 }
 0x636   : > { %v395_v11 = vmul.f32 %v394_v10, %v394_v10 }
 0x638   : > { %v396_v12 = vsel %vm186_vm0, %v395_v11, 0.0 }
 0x639   : > { %397 = vadd.xlane.f32.xlu2 %v396_v12 }
 0x6ac   : > { %v398_v13 = vpop.xlane.xlu2 %397 }
 0x6ad   : > { %v399_v14 = vmul.f32 %v398_v13, %v315_v36 }
 0x6af   : > { %v400_v15 = vadd.f32 1e-05, %v399_v14 }
 0x6b1   : > { %599 = vrsqrt.f32 %v400_v15  ;;  %vm407_vm9 = vweird.f32 %v400_v15 }
 0x6b7   : > { %v600_v16 = vpop.eup %599 }
 0x6b8   : > { %v402_v17 = vmul.f32 %v600_v16, %v400_v15  ;;  %vm408_vm8 = vweird.f32 %v600_v16 }
 0x6b9   : > { %vm409_vm10 = vmor %vm407_vm9, %vm408_vm8 }
 0x6ba   : > { %v403_v18 = vmul.f32 %v600_v16, %v402_v17 }
 0x6bc   : > { %v404_v19 = vmul.f32 0.5, %v403_v18 }
 0x6be   : > { %v405_v20 = vsub.f32 1.5, %v404_v19 }
 0x6c0   : > { %v406_v21 = vmul.f32 %v600_v16, %v405_v20 }
 0x6c2   : > { %v410_v23 = vsel %vm409_vm10, %v600_v16, %v406_v21 }
 0x6c3   : > { %v411_v24 = vmul.f32 %v410_v23, %v394_v10 }
 0x6c5   : > { %v413_v26 = vmul.f32 %v589_v22, %v411_v24 }
 0x6c7   : > { %v415_v27 = vadd.f32 %v590_v25, %v413_v26 }
 0x6c9   : > { %v416_v28 = vmul.f32 %v415_v27, %v415_v27 }
 0x6cb   : > { %v417_v29 = vsel %vm186_vm0, %v416_v28, 0.0 }
 0x6cc   : > { %418 = vadd.xlane.f32.xlu2 %v417_v29 }
 0x73f   : > { %v419_v30 = vpop.xlane.xlu2 %418 }
 0x740   : > { %601 = vrsqrt.f32 %v419_v30  ;;  %vm427_vm11 = vcmp.eq.f32.partialorder %v419_v30, inf  ;;  %v430_v38 = vand.u32 2147483648, %v419_v30  ;;  %vm429_vm12 = vcmp.eq.f32.partialorder %v419_v30, 0.0 }
 0x746   : > { %v602_v31 = vpop.eup %601 }
 0x747   : > { %v421_v32 = vmul.f32 %v602_v31, %v419_v30 }
 0x749   : > { %v422_v33 = vmul.f32 %v602_v31, %v421_v32 }
 0x74b   : > { %v423_v34 = vmul.f32 0.5, %v422_v33 }
 0x74d   : > { %v424_v35 = vsub.f32 1.5, %v423_v34 }
 0x74f   : > { %v425_v36 = vmul.f32 %v602_v31, %v424_v35 }
 0x751   : > { %v426_v37 = vmul.f32 %v425_v36, %v419_v30 }
 0x753   : > { %v428_v39 = vsel %vm427_vm11, %v419_v30, %v426_v37 }
 0x754   : > { %v431_v40 = vsel %vm429_vm12, %v430_v38, %v428_v39 }
 0x755   : > { %v432_v41 = vmax.f32 %v431_v40, 1e-12 }
 0x757   : > { %603 = vrcp.f32 %v432_v41  ;;  %v444_v45 = vand.u32 2147483648, %v432_v41  ;;  %v442_v47 = vand.u32 2147483647, %v432_v41  ;;  %vm438_vm14 = vweird.f32 %v432_v41 }
 0x759   : > { %v445_v49 = vor.u32 1.1754944e-38, %v444_v45  ;;  %vm443_vm1 = vcmp.eq.f32.partialorder %v442_v47, 8.507059e+37 }
 0x75d   : > { %v604_v42 = vpop.eup %603 }
 0x75e   : > { %v434_v43 = vmul.f32 %v604_v42, %v432_v41  ;;  %vm439_vm13 = vweird.f32 %v604_v42 }
 0x75f   : > { %vm440_vm15 = vmor %vm438_vm14, %vm439_vm13 }
 0x760   : > { %v435_v44 = vsub.f32 1.0, %v434_v43 }
 0x762   : > { %v436_v46 = vmul.f32 %v604_v42, %v435_v44 }
 0x764   : > { %v437_v48 = vadd.f32 %v604_v42, %v436_v46 }
 0x766   : > { %v441_v50 = vsel %vm440_vm15, %v604_v42, %v437_v48 }
 0x767   : > { %v446_v51 = vsel %vm443_vm1, %v445_v49, %v441_v50 }
 0x768   : > { %v447_v52 = vmul.f32 %v446_v51, %v415_v27 }
 0x76a   : > { %448 = vst.msk [vmem:[%s161_s10] sm:$0xff] %vm186_vm0, %v447_v52 }
 0x76b   : > { %632 = shalt.err (!%p629_p3)
}
 0x76c   : > { %541 = dma.vmem_to_hbm [thread:$0]  (%p730_p5), %s463_s11, 128, %s465_s17, %s450_s16  }
 0x76d PF: > { %p547_p4 = scmp.ge.s32.totalorder %s667_s15, 2  ;;  %s476_s29 = sand.u32 1, %s655_s12  }
 0x76e   : > { %s477_s30 = scalar_lea.sflag [#allocation3], %s476_s29 }
 0x76f   : > { %p544_p7 = pnand %p547_p4, %p734_p6 }
 0x771   : > { %p545_p8 = pneg %p544_p7 }
 0x773   : > { %650 = dma.done.wait (%p545_p8), %s477_s30, 128  }
 0x774   : > { %652 = vsyncadd (%p545_p8), %s477_s30, 4294967168  ;;  %p13_p9 = scmp.ge.s32.totalorder %s717_s18, 4   ;;  %s851_s12 = smov %s659_s13 }
 0x775   : > { %s852_s13 = smov %s663_s14  ;;  %s853_s14 = smov %s728_s21 }
 0x776   : > { %s854_s15 = smov %s717_s18  ;;  %15 = sbr.rel (!%p13_p9) target bundleno = 3 (0x3), region = 67 }
 0x77b   :  { %483 = vsyncpa [#allocation3], 1 }
 0x77c   :  { %485 = vsyncpa [#allocation3 + $0x1], 1 }

</bundles_post_ra>
